<compile_context>
chip_gen: v6e
topology: v6e:2x2x1
jax: 0.10.0
libtpu: 0.0.40
codegen_flags: <defaults>
</compile_context>

<pallas_src>
import jax
import jax.numpy as jnp
from jax.experimental import pallas as pl
from jax.experimental.pallas import tpu as pltpu


def _noise_emb2_kernel(x_ref, w_ref, o_ref):
    # x_ref: (bt, 1)      per-row noise levels
    # w_ref: (1, half)    frequency row (shared across the batch)
    # o_ref: (bt, 2*half) [cos | sin]
    f = (2.0 * jnp.pi) * x_ref[...] * w_ref[...]          # broadcast outer product (VPU)
    o_ref[...] = jnp.concatenate([jnp.cos(f), jnp.sin(f)], axis=-1)   # EUP + one dense store


def noise_embedding2(c_noise, weight):
    """c_noise: (B,), weight: (1, D/2).  Returns (B, D) = [cos(2*pi*x*w), sin(2*pi*x*w)]."""
    assert c_noise.ndim == 1
    B = c_noise.shape[0]
    half = weight.shape[-1]
    D = 2 * half

    # Batch tile: whole batch if tiny, else sublane-aligned strips of 8.
    bt = B if B <= 8 else 8
    assert B % bt == 0, "batch must be a multiple of the batch tile"

    x2d = c_noise.astype(jnp.float32).reshape(B, 1)
    w2d = weight.astype(jnp.float32).reshape(1, half)

    return pl.pallas_call(
        _noise_emb2_kernel,
        out_shape=jax.ShapeDtypeStruct((B, D), jnp.float32),
        grid_spec=pltpu.PrefetchScalarGridSpec(
            num_scalar_prefetch=0,
            grid=(B // bt,),
            in_specs=[
                pl.BlockSpec((bt, 1), lambda i: (i, 0)),       # per-tile noise rows
                pl.BlockSpec((1, half), lambda i: (0, 0)),     # frequency row (resident)
            ],
            out_specs=pl.BlockSpec((bt, D), lambda i: (i, 0)),  # lane-dense output slab
        ),
        compiler_params=pltpu.CompilerParams(
            dimension_semantics=("parallel",)),                 # v7x: both TCs when B >= 16
    )(x2d, w2d)


if __name__ == "__main__":
    IMAGE_SIZE = 16           # output features D = 256 (= 2 * 128 lanes)
    B = 2

    key = jax.random.PRNGKey(0)
    kw, kx = jax.random.split(key)
    weight = jax.random.normal(kw, (1, IMAGE_SIZE ** 2 // 2), jnp.float32)  # buffer
    c_noise = jax.random.uniform(kx, (B,), jnp.float32)                      # 1-D input

    out = jax.block_until_ready(noise_embedding2(c_noise, weight))

    # pure-JAX reference (same math as the PyTorch module)
    f_ref = 2.0 * jnp.pi * c_noise[:, None] * weight
    ref = jnp.concatenate([jnp.cos(f_ref), jnp.sin(f_ref)], axis=-1)

    assert out.shape == (B, IMAGE_SIZE ** 2), out.shape
    assert jnp.allclose(out, ref, atol=1e-4, rtol=1e-4), float(jnp.max(jnp.abs(out - ref)))
    print("KERNEL_OK")
</pallas_src>

<mosaic_0001>
module attributes {stable_mosaic.version = 11 : i64} {
  func.func @_noise_emb2_kernel(%arg0: i32, %arg1: memref<2x1xf32, #tpu.memory_space<vmem>>, %arg2: memref<1x128xf32, #tpu.memory_space<vmem>>, %arg3: memref<2x256xf32, #tpu.memory_space<vmem>>) attributes {dimension_semantics = [#tpu.dimension_semantics<parallel>], iteration_bounds = array<i64: 1>, scalar_prefetch = 0 : i64, scratch_operands = 0 : i64, tpu.core_type = #tpu.core_type<tc>, window_params = [{transform_indices = @transform_0, window_bounds = array<i64: 2, 1>}, {pipeline_mode = #tpu.pipeline_mode<synchronous>, transform_indices = @transform_1, window_bounds = array<i64: 1, 128>}, {transform_indices = @transform_2, window_bounds = array<i64: 2, 256>}]} {
    %c0 = arith.constant 0 : index
    %c0_0 = arith.constant 0 : index
    %0 = vector.load %arg1[%c0, %c0_0] : memref<2x1xf32, #tpu.memory_space<vmem>>, vector<2x1xf32>
    %cst = arith.constant 6.28318548 : f32
    %1 = vector.broadcast %cst : f32 to vector<2x1xf32>
    %2 = arith.mulf %1, %0 : vector<2x1xf32>
    %c0_1 = arith.constant 0 : index
    %c0_2 = arith.constant 0 : index
    %3 = vector.load %arg2[%c0_1, %c0_2] : memref<1x128xf32, #tpu.memory_space<vmem>>, vector<1x128xf32>
    %4 = vector.broadcast %2 : vector<2x1xf32> to vector<2x128xf32>
    %5 = vector.broadcast %3 : vector<1x128xf32> to vector<2x128xf32>
    %6 = arith.mulf %4, %5 : vector<2x128xf32>
    %7 = math.cos %6 : vector<2x128xf32>
    %8 = math.sin %6 : vector<2x128xf32>
    %9 = tpu.concatenate %7, %8 in 1 : vector<2x128xf32>, vector<2x128xf32> -> vector<2x256xf32>
    %c0_3 = arith.constant 0 : index
    %c0_4 = arith.constant 0 : index
    %10 = vector.load %arg3[%c0_3, %c0_4] : memref<2x256xf32, #tpu.memory_space<vmem>>, vector<2x256xf32>
    tpu.vector_store %arg3[%c0_3, %c0_4], %9 {strides = array<i32>} : memref<2x256xf32, #tpu.memory_space<vmem>>, vector<2x256xf32>,
    return
  }
  func.func @transform_0(%arg0: i32) -> (i32, i32) {
    %c0_i32 = arith.constant 0 : i32
    %c0_i32_0 = arith.constant 0 : i32
    return %arg0, %c0_i32 : i32, i32
  }
  func.func @transform_1(%arg0: i32) -> (i32, i32) {
    %c0_i32 = arith.constant 0 : i32
    %c0_i32_0 = arith.constant 0 : i32
    %c0_i32_1 = arith.constant 0 : i32
    return %c0_i32, %c0_i32_0 : i32, i32
  }
  func.func @transform_2(%arg0: i32) -> (i32, i32) {
    %c0_i32 = arith.constant 0 : i32
    %c0_i32_0 = arith.constant 0 : i32
    return %arg0, %c0_i32 : i32, i32
  }
}

</mosaic_0001>

<bundles_post_ra>
// kernel: tpu_custom_call.1
= control target key start
LH: loop header
LB: loop body
LE: loop exit
PB: predicated region body
PF: predicated region fallthrough
CT: control target
= control target key end

     0   :  { %v309_v1 = vmov 0   ;;  %s362_s0 = inlined_call_operand.vmem [shape: f32[2,1], index: 0, kind: input, shape index: {}]   ;;  %s363_s1 = inlined_call_operand.vmem [shape: f32[1,128], index: 1, kind: input, shape index: {}]   ;;  %s364_s2 = inlined_call_operand.hbm [shape: f32[2,256], index: 2, kind: output, shape index: {}]  }
   0x1   :  { %v12_v0 = vld [vmem:[%s362_s0] sm:$0x3]  ;;  %282 = vset.pattern.permute.xlu0 %v309_v1 }
   0x2   :  { %v13_v2 = vmul.f32 6.2831855, %v12_v0 }
   0x4   :  { %17 = vperm.xlu0 %282, %v13_v2  }
   0x5   :  { %7 = vsyncpa [#allocation3], 0  ;;  %v260_v3 = vld [vmem:[%s363_s1] ss:$0 sm:$0xff]  ;;  %v310_v16 = vmov 683565275  }
   0x6   :  { %v311_v18 = vmov 2475754826   ;;  %v312_v21 = vmov 2131351028   ;;  %v313_v24 = vmov 2102212464  }
   0x7   :  { %v314_v27 = vmov 920167782   ;;  %v315_v30 = vmov 1326507024   ;;  %s316_s0 = smov [#allocation2]  }
   0x8   :  { %s252_s1 = sshll.u32 %s316_s0, 4  ;;  %s253_s1 = int_to_ptr.vmem [resolvable:$true] %s252_s1 }
   0x9   :  { %s287_s13 = scalar_lea.vmem %s253_s1, 64  ;;  %p292_p1 = scmp.lt.s32.totalorder %s253_s1, %s253_s1 }
   0xa   :  { %p288_p0 = scmp.ne.s32.totalorder %s253_s1, %s287_s13  ;;  %p293_p2 = scmp.lt.s32.totalorder %s287_s13, %s287_s13 }
   0xc   :  { %p294_p3 = por %p293_p2, %p292_p1 }
   0xe   :  { %p295_p4 = pnand %p294_p3, %p288_p0 }
  0x7f   :  { %v18_v4 = vpop.permute.xlu0 %17 }
  0x80   :  { %v338_v5 = vmul.f32 %v260_v3, %v18_v4 }
  0x82   :  { %v30_v6 = vand.u32 2139095040, %v338_v5  ;;  %v27_v10 = vand.u32 2147483647, %v338_v5  ;;  %vm29_vm7 = vcmp.lt.s32.totalorder %v338_v5, 0  ;;  %vm119_vm15 = vweird.f32 %v338_v5 }
  0x84   :  { %v31_v7 = vshrl.u32 %v30_v6, 23  ;;  %v34_v13 = vand.u32 8388607, %v27_v10  ;;  %vm28_vm8 = vcmp.le.f32.partialorder %v27_v10, 0.7853982 }
  0x86   :  { %v261_v8 = vadd.s32 4294967169, %v31_v7  ;;  %v35_v32 = vor.u32 8388608, %v34_v13 }
  0x88   :  { %v37_v9 = vadd.s32 1, %v261_v8  ;;  %v75_v46 = vshll.u32 %v35_v32, 8 }
  0x8a   :  { %vm38_vm0 = vcmp.gt.s32.totalorder %v37_v9, 0 }
  0x8b   :  { %v39_v11 = vsel %vm38_vm0, %v37_v9, 0 }
  0x8c   :  { %v41_v12 = vand.u32 31, %v39_v11  ;;  %v40_v15 = vshrl.u32 %v39_v11, 5 }
  0x8e   :  { %v42_v14 = vsub.s32 32, %v41_v12  ;;  %v44_v17 = vshll.u32 %v310_v16, %v41_v12  ;;  %v47_v19 = vshll.u32 %v311_v18, %v41_v12  ;;  %v50_v23 = vshll.u32 %v312_v21, %v41_v12 }
  0x8f   :  { %v53_v26 = vshll.u32 %v313_v24, %v41_v12  ;;  %v56_v29 = vshll.u32 %v314_v27, %v41_v12  ;;  %vm59_vm1 = vcmp.lt.s32.totalorder %v40_v15, 1  ;;  %vm62_vm2 = vcmp.lt.s32.totalorder %v40_v15, 4 }
  0x90   :  { %v45_v20 = vshrl.u32 %v311_v18, %v42_v14  ;;  %v48_v22 = vshrl.u32 %v312_v21, %v42_v14  ;;  %v51_v25 = vshrl.u32 %v313_v24, %v42_v14  ;;  %v54_v28 = vshrl.u32 %v314_v27, %v42_v14 }
  0x91   :  { %v57_v31 = vshrl.u32 %v315_v30, %v42_v14  ;;  %v43_v41 = vshrl.u32 %v310_v16, %v42_v14  ;;  %vm61_vm3 = vcmp.lt.s32.totalorder %v40_v15, 3  ;;  %vm60_vm4 = vcmp.lt.s32.totalorder %v40_v15, 2 }
  0x92   :  { %v46_v33 = vor.u32 %v45_v20, %v44_v17  ;;  %v49_v34 = vor.u32 %v48_v22, %v47_v19  ;;  %v52_v35 = vor.u32 %v51_v25, %v50_v23  ;;  %v55_v36 = vor.u32 %v54_v28, %v53_v26 }
  0x93   :  { %v58_v37 = vor.u32 %v57_v31, %v56_v29 }
  0x94   :  { %v64_v38 = vsel %vm62_vm2, %v52_v35, 2102212464  ;;  %v67_v39 = vsel %vm59_vm1, %v46_v33, %v49_v34  ;;  %v71_v40 = vsel %vm59_vm1, %v49_v34, %v52_v35  ;;  %v68_v42 = vsel %vm62_vm2, %v55_v36, 920167782 }
  0x95   :  { %v72_v43 = vsel %vm62_vm2, %v58_v37, 1326507024  ;;  %v69_v44 = vsel %vm61_vm3, %v52_v35, %v68_v42  ;;  %v63_v47 = vsel %vm59_vm1, %v43_v41, %v46_v33  ;;  %v65_v48 = vsel %vm61_vm3, %v49_v34, %v64_v38 }
  0x96   :  { %v73_v45 = vsel %vm61_vm3, %v55_v36, %v72_v43  ;;  %v70_v49 = vsel %vm60_vm4, %v67_v39, %v69_v44  ;;  %v66_v55 = vsel %vm60_vm4, %v63_v47, %v65_v48 }
  0x97   :  { %v74_v50 = vsel %vm60_vm4, %v71_v40, %v73_v45  ;;  %v347_v53 = vmul.u32.u64.low %v75_v46, %v70_v49  ;;  %v348_v54 = vmul.u32.u64.high %v75_v46, %v70_v49, %v347_v53  ;;  %v82_v57 = vmul.u32 %v75_v46, %v66_v55 }
  0x98   :  { %v344_v51 = vmul.u32.u64.low %v75_v46, %v74_v50  ;;  %v345_v52 = vmul.u32.u64.high %v75_v46, %v74_v50, %v344_v51 }
  0x99   :  { %v85_v56 = vadd.s32 1, %v348_v54 }
  0x9a   :  { %vm84_vm5 = vc.u32 %v345_v52, %v347_v53  ;;  %v83_v6 = vadd.s32 %v347_v53, %v345_v52 }
  0x9b   :  { %v86_v58 = vsel %vm84_vm5, %v85_v56, %v348_v54 }
  0x9c   :  { %v87_v59 = vadd.s32 %v86_v58, %v82_v57 }
  0x9e   :  { %v88_v60 = vadd.s32 536870912, %v87_v59 }
  0xa0   :  { %v89_v61 = vshrl.u32 %v88_v60, 30 }
  0xa2   :  { %v90_v62 = vshll.u32 %v89_v61, 30  ;;  %v113_v20 = vsub.s32 4, %v89_v61 }
  0xa4   :  { %v91_v63 = vsub.s32 %v87_v59, %v90_v62  ;;  %v114_v23 = vsel %vm29_vm7, %v113_v20, %v89_v61 }
  0xa5   :  { %v116_v24 = vsel %vm28_vm8, 0, %v114_v23 }
  0xa6   :  { %v93_v0 = vsub.s32 0, %v91_v63  ;;  %v223_v25 = vadd.s32 3, %v116_v24  ;;  %v120_v26 = vand.u32 3, %v116_v24 }
  0xa8   :  { %v262_v1 = vmin.u32 %v93_v0, %v91_v63  ;;  %v224_v27 = vand.u32 3, %v223_v25  ;;  %vm125_vm9 = vcmp.eq.s32.totalorder %v120_v26, 2  ;;  %vm122_vm11 = vcmp.eq.s32.totalorder %v120_v26, 0 }
  0xa9   :  { %vm121_vm13 = vcmp.lt.s32.totalorder %v120_v26, 2 }
  0xaa   :  { %v95_v2 = vclz %v262_v1  ;;  %vm229_vm10 = vcmp.eq.s32.totalorder %v224_v27, 2  ;;  %vm226_vm12 = vcmp.eq.s32.totalorder %v224_v27, 0  ;;  %vm225_vm14 = vcmp.lt.s32.totalorder %v224_v27, 2 }
  0xac   :  { %v263_v3 = vadd.s32 4294967294, %v95_v2 }
  0xae   :  { %vm264_vm6 = vcmp.lt.s32.totalorder %v263_v3, 0 }
  0xaf   :  { %v98_v4 = vsel %vm264_vm6, 0, %v263_v3 }
  0xb0   :  { %v99_v7 = vsub.s32 32, %v98_v4  ;;  %v103_v8 = vsub.s32 4294967266, %v98_v4  ;;  %v100_v9 = vshll.u32 %v91_v63, %v98_v4 }
  0xb2   :  { %v101_v11 = vshrl.u32 %v83_v6, %v99_v7  ;;  %v104_v12 = vadd.s32 127, %v103_v8 }
  0xb4   :  { %v102_v13 = vor.u32 %v101_v11, %v100_v9  ;;  %v105_v14 = vshll.u32 %v104_v12, 23 }
  0xb6   :  { %v106_v15 = vor.u32 4788187, %v105_v14  ;;  %v109_v17 = vcvt.s32.f32 %v102_v13 }
  0xb8   :  { %v107_v16 = vand.u32 2147483647, %v106_v15 }
  0xba   :  { %v110_v18 = vmul.f32 %v109_v17, %v107_v16 }
  0xbc   :  { %v111_v19 = vxor.u32 2147483648, %v110_v18 }
  0xbe   :  { %v112_v21 = vsel %vm29_vm7, %v111_v19, %v110_v18 }
  0xbf   :  { %v115_v22 = vsel %vm28_vm8, %v338_v5, %v112_v21 }
  0xc0   :  { %283 = vcosq.f32 %v115_v22 }
  0xc1   :  { %285 = vsinq.f32 %v115_v22 }
  0xcd   :  { %v284_v28 = vpop.eup %283 }
  0xce   :  { %v286_v29 = vpop.eup %285  ;;  %v126_v30 = vxor.u32 2147483648, %v284_v28 }
  0xcf   :  { %v123_v31 = vxor.u32 2147483648, %v286_v29 }
  0xd0   :  { %v127_v32 = vsel %vm125_vm9, %v126_v30, %v286_v29  ;;  %v231_v10 = vsel %vm229_vm10, %v126_v30, %v286_v29 }
  0xd1   :  { %v124_v33 = vsel %vm122_vm11, %v284_v28, %v123_v31  ;;  %v228_v34 = vsel %vm226_vm12, %v284_v28, %v123_v31 }
  0xd2   :  { %v128_v35 = vsel %vm121_vm13, %v124_v33, %v127_v32  ;;  %v232_v36 = vsel %vm225_vm14, %v228_v34, %v231_v10 }
  0xd3   :  { %v129_v37 = vsel %vm119_vm15, nan, %v128_v35  ;;  %v233_v38 = vsel %vm119_vm15, nan, %v232_v36 }
  0xd4   :  { %v236_v39 = vcombine.low %v129_v37, %v233_v38 }
  0xd6   :  { %269 = vst.sshfl [vmem:[#allocation2] sm:$0x33 pattern:$0x76325410] %v236_v39 }
  0xd7   :  { %298 = shalt.err (!%p295_p4)
}
  0xd8   :  { %255 = dma.vmem_to_hbm [thread:$0]  %s253_s1, 64, %s364_s2, [#allocation3]  }
  0xd9   :  { %307 = dma.done.wait [#allocation3], 64  }
  0xda   :  { %308 = vsyncadd [#allocation3], 4294967232 }
  0xdb   :  { %259 = vsyncpa [#allocation3], 1 }

</bundles_post_ra>
